<compile_context>
chip_gen: v7x
topology: tpu7x:2x2x1
jax: 0.10.0
libtpu: 0.0.40
codegen_flags: <defaults>
</compile_context>

<pallas_src>
import functools

import jax
import jax.numpy as jnp
from jax import lax
from jax.experimental import pallas as pl
from jax.experimental.pallas import tpu as pltpu

_LANE = 128
_SUBLANE = 8
_PAD_UNIT = _SUBLANE * _LANE              # 1024: guarantees rows % 8 == 0
_TARGET_TILE_BYTES = 4 * 1024 * 1024      # ~4 MiB per input per pipeline buffer
_CHUNK_ELEMS = 8 * 1024                   # ~8 vregs of f32 work per chunk
_VMEM_LIMIT_BYTES = 48 * 1024 * 1024      # explicit budget (ok on v5e/v6e/v7x)


def _bexp_mae_kernel(y_pre_ref, y_true_ref, out_ref, *, a, b, tile_rows,
                     chunk_rows, width, total_rows, apply_mask):
    a_f = jnp.float32(a)
    b_f = jnp.float32(b)
    num_chunks = tile_rows // chunk_rows
    lane_groups = width // _LANE

    def contrib(r0, acc):
        # Cast in-kernel (VPU); inputs stream in their original dtype.
        yp = y_pre_ref[pl.ds(r0, chunk_rows), :].astype(jnp.float32)
        yt = y_true_ref[pl.ds(r0, chunk_rows), :].astype(jnp.float32)
        weight = jnp.exp(yt * a_f) - b_f
        c = jnp.abs(yp - yt) * weight                 # (chunk_rows, width) f32
        if apply_mask:
            # Ragged final grid block: zero rows past the logical end.  Row-
            # index-only mask: (chunk_rows, 1) iota, broadcast by the select.
            row_ids = (pl.program_id(0) * tile_rows + r0 +
                       lax.broadcasted_iota(jnp.int32, (chunk_rows, 1), 0))
            c = jnp.where(row_ids < total_rows, c, 0.0)
        # Per-8-row tree reduce: matches the (8, 128) register tiling, so the
        # reshape is free and the sum is pure elementwise VPU adds.
        c = c.reshape(chunk_rows // _SUBLANE, _SUBLANE, width).sum(axis=0)
        # Static 128-lane tiles: whole-vreg adds into the accumulator.
        for g in range(lane_groups):
            acc = acc + c[:, g * _LANE:(g + 1) * _LANE]
        return acc

    acc0 = jnp.zeros((_SUBLANE, _LANE), jnp.float32)
    if num_chunks == 1:
        acc = contrib(0, acc0)
    else:
        acc = lax.fori_loop(
            0, num_chunks,
            lambda i, acc: contrib(
                pl.multiple_of(i * chunk_rows, _SUBLANE), acc),
            acc0, unroll=2)
    out_ref[...] = acc.reshape(1, _SUBLANE, _LANE)


def bexp_mae_loss(y_pre, y_true, a=6.0, b=0.8):
    """Weighted MAE: mean(|y_pre - y_true| * (exp(a * y_true) - b))."""
    assert y_pre.shape == y_true.shape
    n = int(y_pre.size)
    assert n > 0

    # NOTE: inputs are assumed to carry the default row-major layout, so ravel
    # is a free bitcast (an odd layout would add a hidden HBM copy before the
    # kernel and dominate this single-pass, HBM-bound op).
    yp = jnp.ravel(y_pre)
    yt = jnp.ravel(y_true)

    # Zero-pad to a multiple of 8*128 so the 2D view is whole (8,128) tiles
    # and rows is always a multiple of 8.  Padding contributes exactly 0.
    n_pad = ((n + _PAD_UNIT - 1) // _PAD_UNIT) * _PAD_UNIT
    if n_pad != n:
        yp = jnp.pad(yp, (0, n_pad - n))
        yt = jnp.pad(yt, (0, n_pad - n))

    # Widest lane count that keeps rows a multiple of 8 (128 always works).
    width = _LANE
    for cand in (1024, 512, 256):
        if n_pad % cand == 0 and (n_pad // cand) % _SUBLANE == 0:
            width = cand
            break
    rows = n_pad // width
    yp2 = yp.reshape(rows, width)
    yt2 = yt.reshape(rows, width)

    # ---- tile selection (multiples of 8 rows) -----------------------------
    itemsize = yp2.dtype.itemsize
    target_rows = max(
        _SUBLANE,
        (_TARGET_TILE_BYTES // itemsize // width) // _SUBLANE * _SUBLANE)
    target_rows = min(target_rows, rows)
    if rows >= 2 * _SUBLANE:
        # Guarantee >= 2 grid blocks so v7x's second TensorCore gets work.
        target_rows = min(target_rows,
                          max(_SUBLANE, (rows // 2) // _SUBLANE * _SUBLANE))

    # Prefer a tile_rows near the target that divides rows exactly (no ragged
    # block, no masking, no over-read); otherwise fall back to masking.
    tile_rows = target_rows
    apply_mask = True
    t = target_rows
    while t >= max(_SUBLANE, target_rows // 2):
        if rows % t == 0:
            tile_rows = t
            apply_mask = False
            break
        t -= _SUBLANE
    grid = (rows + tile_rows - 1) // tile_rows

    # In-kernel accumulation chunk: ~8K f32 elements, must divide tile_rows.
    chunk_rows = min(tile_rows,
                     max(_SUBLANE,
                         (_CHUNK_ELEMS // width) // _SUBLANE * _SUBLANE))
    while tile_rows % chunk_rows != 0:
        chunk_rows -= _SUBLANE

    kernel = functools.partial(
        _bexp_mae_kernel, a=float(a), b=float(b), tile_rows=tile_rows,
        chunk_rows=chunk_rows, width=width, total_rows=rows,
        apply_mask=apply_mask)

    in_bytes = yp2.size * itemsize + yt2.size * itemsize
    out_bytes = grid * _SUBLANE * _LANE * 4
    cost = pl.CostEstimate(
        flops=6 * n_pad,             # mul, sub, abs, mul, ~2 reduce adds
        transcendentals=n_pad,       # one exp per element
        bytes_accessed=in_bytes + out_bytes,
    )

    partials = pl.pallas_call(
        kernel,
        out_shape=jax.ShapeDtypeStruct((grid, _SUBLANE, _LANE), jnp.float32),
        grid=(grid,),
        in_specs=[
            pl.BlockSpec((tile_rows, width), lambda i: (i, 0)),
            pl.BlockSpec((tile_rows, width), lambda i: (i, 0)),
        ],
        out_specs=pl.BlockSpec((1, _SUBLANE, _LANE), lambda i: (i, 0, 0)),
        compiler_params=pltpu.CompilerParams(
            dimension_semantics=("parallel",),      # megacore sharding on v7x
            vmem_limit_bytes=_VMEM_LIMIT_BYTES),
        cost_estimate=cost,
    )(yp2, yt2)

    # Tiny tree reduction over per-block (8,128) partials; padded elements
    # contribute 0, so divide by the original element count.
    return jnp.sum(partials) / jnp.float32(n)


def _reference(y_pre, y_true, a=6.0, b=0.8):
    yp = y_pre.astype(jnp.float32)
    yt = y_true.astype(jnp.float32)
    w = jnp.exp(yt * a) - b
    return jnp.mean(jnp.abs(yp - yt) * w)


if __name__ == "__main__":
    key = jax.random.PRNGKey(0)
    k1, k2, k3, k4 = jax.random.split(key, 4)

    # 4D NCHW radar-like inputs; y_true lies in [0, 1] as the module asserts.
    shape = (2, 4, 16, 16)
    y_true = jax.random.uniform(k1, shape, dtype=jnp.float32,
                                minval=0.0, maxval=1.0)
    y_pre = jax.random.uniform(k2, shape, dtype=jnp.float32,
                               minval=0.0, maxval=1.0)
    loss = jax.block_until_ready(bexp_mae_loss(y_pre, y_true, a=6.0, b=0.8))
    ref = _reference(y_pre, y_true, a=6.0, b=0.8)
    assert jnp.allclose(loss, ref, rtol=1e-5, atol=1e-6), (loss, ref)

    # Slightly larger case: exercises the multi-block "parallel" grid and the
    # chunked fori_loop accumulation path.
    shape2 = (2, 4, 64, 64)
    y_true2 = jax.random.uniform(k3, shape2, dtype=jnp.float32,
                                 minval=0.0, maxval=1.0)
    y_pre2 = jax.random.uniform(k4, shape2, dtype=jnp.float32,
                                minval=0.0, maxval=1.0)
    loss2 = jax.block_until_ready(bexp_mae_loss(y_pre2, y_true2, a=6.0, b=0.8))
    ref2 = _reference(y_pre2, y_true2, a=6.0, b=0.8)
    assert jnp.allclose(loss2, ref2, rtol=1e-5, atol=1e-6), (loss2, ref2)

    print("KERNEL_OK")
</pallas_src>

<mosaic_0001>
module attributes {stable_mosaic.version = 11 : i64} {
  func.func @_bexp_mae_kernel(%arg0: i32, %arg1: memref<8x256xf32, #tpu.memory_space<vmem>>, %arg2: memref<8x256xf32, #tpu.memory_space<vmem>>, %arg3: memref<1x8x128xf32, #tpu.memory_space<vmem>>) attributes {dimension_semantics = [#tpu.dimension_semantics<parallel>], iteration_bounds = array<i64: 1>, scalar_prefetch = 0 : i64, scratch_operands = 0 : i64, tpu.core_type = #tpu.core_type<tc>, window_params = [{transform_indices = @transform_0, window_bounds = array<i64: 8, 256>}, {transform_indices = @transform_1, window_bounds = array<i64: 8, 256>}, {transform_indices = @transform_2, window_bounds = array<i64: 1, 8, 128>}]} {
    %cst = arith.constant 0.000000e+00 : f32
    %0 = vector.broadcast %cst : f32 to vector<8x128xf32>
    %c0 = arith.constant 0 : index
    %c0_0 = arith.constant 0 : index
    %1 = vector.load %arg1[%c0, %c0_0] : memref<8x256xf32, #tpu.memory_space<vmem>>, vector<8x256xf32>
    %c0_1 = arith.constant 0 : index
    %c0_2 = arith.constant 0 : index
    %2 = vector.load %arg2[%c0_1, %c0_2] : memref<8x256xf32, #tpu.memory_space<vmem>>, vector<8x256xf32>
    %cst_3 = arith.constant 6.000000e+00 : f32
    %3 = vector.broadcast %cst_3 : f32 to vector<8x256xf32>
    %4 = arith.mulf %2, %3 : vector<8x256xf32>
    %5 = math.exp %4 : vector<8x256xf32>
    %cst_4 = arith.constant 8.000000e-01 : f32
    %6 = vector.broadcast %cst_4 : f32 to vector<8x256xf32>
    %7 = arith.subf %5, %6 : vector<8x256xf32>
    %8 = arith.subf %1, %2 : vector<8x256xf32>
    %9 = math.absf %8 : vector<8x256xf32>
    %10 = arith.mulf %9, %7 : vector<8x256xf32>
    %11 = vector.shape_cast %10 : vector<8x256xf32> to vector<1x8x256xf32>
    %cst_5 = arith.constant dense<0.000000e+00> : vector<8x256xf32>
    %12 = vector.multi_reduction <add>, %11, %cst_5 [0] : vector<1x8x256xf32> to vector<8x256xf32>
    %13 = vector.extract_strided_slice %12 {offsets = [0, 0], sizes = [8, 128], strides = [1, 1]} : vector<8x256xf32> to vector<8x128xf32>
    %14 = arith.addf %0, %13 : vector<8x128xf32>
    %15 = vector.extract_strided_slice %12 {offsets = [0, 128], sizes = [8, 128], strides = [1, 1]} : vector<8x256xf32> to vector<8x128xf32>
    %16 = arith.addf %14, %15 : vector<8x128xf32>
    %17 = vector.shape_cast %16 : vector<8x128xf32> to vector<1x8x128xf32>
    %c0_6 = arith.constant 0 : index
    %c0_7 = arith.constant 0 : index
    %c0_8 = arith.constant 0 : index
    %18 = vector.load %arg3[%c0_6, %c0_7, %c0_8] : memref<1x8x128xf32, #tpu.memory_space<vmem>>, vector<1x8x128xf32>
    tpu.vector_store %arg3[%c0_6, %c0_7, %c0_8], %17 {strides = array<i32>} : memref<1x8x128xf32, #tpu.memory_space<vmem>>, vector<1x8x128xf32>,
    return
  }
  func.func @transform_0(%arg0: i32) -> (i32, i32) {
    %c0_i32 = arith.constant 0 : i32
    %c0_i32_0 = arith.constant 0 : i32
    return %arg0, %c0_i32 : i32, i32
  }
  func.func @transform_1(%arg0: i32) -> (i32, i32) {
    %c0_i32 = arith.constant 0 : i32
    %c0_i32_0 = arith.constant 0 : i32
    return %arg0, %c0_i32 : i32, i32
  }
  func.func @transform_2(%arg0: i32) -> (i32, i32, i32) {
    %c0_i32 = arith.constant 0 : i32
    %c0_i32_0 = arith.constant 0 : i32
    %c0_i32_1 = arith.constant 0 : i32
    return %arg0, %c0_i32, %c0_i32_0 : i32, i32, i32
  }
}

</mosaic_0001>

<bundles_post_ra>
// kernel: tpu_custom_call.1
= control target key start
LH: loop header
LB: loop body
LE: loop exit
PB: predicated region body
PF: predicated region fallthrough
CT: control target
= control target key end

     0   :  { %7 = vsyncpa [#allocation3], 0  ;;  %s210_s0 = inlined_call_operand.hbm [shape: f32[8,256], index: 0, kind: input, shape index: {}]   ;;  %s211_s1 = inlined_call_operand.hbm [shape: f32[8,256], index: 1, kind: input, shape index: {}]   ;;  %s212_s2 = inlined_call_operand.hbm [shape: f32[1,8,128], index: 2, kind: output, shape index: {}]  }
   0x1   :  { %8 = vsyncpa [#allocation6], 0 }
   0x2   :  { %9 = vsyncpa [#allocation4], 0  ;;  %s156_s9 = smov [#allocation2]   ;;  %s157_s11 = smov [#allocation5]  }
   0x3   :  { %s16_s10 = sshll.u32 %s156_s9, 4  ;;  %s26_s12 = sshll.u32 %s157_s11, 4  ;;  %s17_s10 = int_to_ptr.vmem [resolvable:$true] %s16_s10  ;;  %s27_s12 = int_to_ptr.vmem [resolvable:$true] %s26_s12 }
   0x4   :  { %s84_s15 = scalar_lea.hbm %s210_s0, 256 }
   0x5   :  { %p85_p0 = scmp.ne.s32.totalorder %s210_s0, %s84_s15  ;;  %p88_p1 = scmp.lt.u32.totalorder %s84_s15, %s210_s0 }
   0x7   :  { %p90_p2 = pnand %p88_p1, %p85_p0 }
   0x9   :  { %93 = shalt.err (!%p90_p2)
}
   0xa   :  { %s94_s20 = scalar_lea.vmem %s17_s10, 256  ;;  %p99_p4 = scmp.lt.s32.totalorder %s17_s10, %s17_s10 }
   0xb   :  { %p95_p3 = scmp.ne.s32.totalorder %s17_s10, %s94_s20  ;;  %p100_p5 = scmp.lt.s32.totalorder %s94_s20, %s94_s20 }
   0xd   :  { %p101_p6 = por %p100_p5, %p99_p4 }
   0xf   :  { %p102_p7 = pnand %p101_p6, %p95_p3 }
  0x11   :  { %105 = shalt.err (!%p102_p7)
}
  0x12   :  { %19 = dma.hbm_to_vmem [thread:$0]  %s210_s0, 256, %s17_s10, [#allocation3]  }
  0x13   :  { %s106_s25 = scalar_lea.hbm %s211_s1, 256 }
  0x14   :  { %p107_p8 = scmp.ne.s32.totalorder %s211_s1, %s106_s25  ;;  %p110_p9 = scmp.lt.u32.totalorder %s106_s25, %s211_s1 }
  0x16   :  { %p112_p10 = pnand %p110_p9, %p107_p8 }
  0x18   :  { %115 = shalt.err (!%p112_p10)
}
  0x19   :  { %s116_s30 = scalar_lea.vmem %s27_s12, 256  ;;  %p121_p12 = scmp.lt.s32.totalorder %s27_s12, %s27_s12 }
  0x1a   :  { %p117_p11 = scmp.ne.s32.totalorder %s27_s12, %s116_s30  ;;  %p122_p13 = scmp.lt.s32.totalorder %s116_s30, %s116_s30 }
  0x1c   :  { %p123_p0 = por %p122_p13, %p121_p12 }
  0x1e   :  { %p124_p1 = pnand %p123_p0, %p117_p11 }
  0x20   :  { %127 = shalt.err (!%p124_p1)
}
  0x21   :  { %29 = dma.hbm_to_vmem [thread:$0]  %s211_s1, 256, %s27_s12, [#allocation6]  }
  0x22   :  { %150 = dma.done.wait [#allocation3], 256  }
  0x23   :  { %151 = vsyncadd [#allocation3], 4294967040 }
  0x24   :  { %152 = dma.done.wait [#allocation6], 256  }
  0x25   :  { %153 = vsyncadd [#allocation6], 4294967040  ;;  %v38_v0 = vld [vmem:[#allocation5] sm:$0xff]  ;;  %v39_v1 = vld [vmem:[#allocation5 + $0x8] sm:$0xff]  ;;  %s158_s1 = smov [#allocation7]  }
  0x26   :  { %v40_v2 = vmul.f32 6.0, %v38_v0  ;;  %v41_v3 = vmul.f32 6.0, %v39_v1  ;;  %v36_v6 = vld [vmem:[#allocation2] sm:$0xff]  ;;  %v37_v7 = vld [vmem:[#allocation2 + $0x8] sm:$0xff]  ;;  %s65_s4 = sshll.u32 %s158_s1, 4  ;;  %s66_s4 = int_to_ptr.vmem [resolvable:$true] %s65_s4 }
  0x27   :  { %v48_v8 = vsub.f32 %v36_v6, %v38_v0  ;;  %v49_v9 = vsub.f32 %v37_v7, %v39_v1  ;;  %s128_s5 = scalar_lea.vmem %s66_s4, 128  ;;  %p133_p3 = scmp.lt.s32.totalorder %s66_s4, %s66_s4 }
  0x28   :  { %v42_v4 = vmul.f32 1.442695, %v40_v2  ;;  %v44_v5 = vmul.f32 1.442695, %v41_v3  ;;  %p129_p2 = scmp.ne.s32.totalorder %s66_s4, %s128_s5  ;;  %p134_p4 = scmp.lt.s32.totalorder %s128_s5, %s128_s5 }
  0x29   :  { %v50_v10 = vand.u32 2147483647, %v48_v8  ;;  %v51_v12 = vand.u32 2147483647, %v49_v9 }
  0x2a   :  { %80 = vpow2.f32 %v42_v4  ;;  %p135_p5 = por %p134_p4, %p133_p3 }
  0x2b   :  { %82 = vpow2.f32 %v44_v5 }
  0x2c   :  { %p136_p6 = pnand %p135_p5, %p129_p2 }
  0x34   :  { %v81_v11 = vpop.eup %80 }
  0x35   :  { %v83_v13 = vpop.eup %82  ;;  %v75_v14 = vadd.f32 -0.8, %v81_v11 }
  0x36   :  { %v76_v15 = vadd.f32 -0.8, %v83_v13 }
  0x37   :  { %v52_v16 = vmul.f32 %v75_v14, %v50_v10 }
  0x38   :  { %v53_v17 = vmul.f32 %v76_v15, %v51_v12 }
  0x3a   :  { %v57_v18 = vadd.f32 %v53_v17, %v52_v16 }
  0x3c   :  { %58 = vst [vmem:[#allocation7] sm:$0xff] %v57_v18 }
  0x3d   :  { %139 = shalt.err (!%p136_p6)
}
  0x3e   :  { %s140_s8 = scalar_lea.hbm %s212_s2, 128 }
  0x3f   :  { %p141_p7 = scmp.ne.s32.totalorder %s212_s2, %s140_s8  ;;  %p144_p8 = scmp.lt.u32.totalorder %s140_s8, %s212_s2 }
  0x41   :  { %p146_p9 = pnand %p144_p8, %p141_p7 }
  0x43   :  { %149 = shalt.err (!%p146_p9)
}
  0x44   :  { %68 = dma.vmem_to_hbm [thread:$0]  %s66_s4, 128, %s212_s2, [#allocation4]  }
  0x45   :  { %154 = dma.done.wait [#allocation4], 128  }
  0x46   :  { %155 = vsyncadd [#allocation4], 4294967168 }
  0x47   :  { %72 = vsyncpa [#allocation3], 1 }
  0x48   :  { %73 = vsyncpa [#allocation6], 1 }
  0x49   :  { %74 = vsyncpa [#allocation4], 1 }

</bundles_post_ra>
